<compile_context>
chip_gen: v7x
topology: tpu7x:2x2x1
jax: 0.10.0
libtpu: 0.0.40
codegen_flags: <defaults>
</compile_context>

<pallas_src>
import math

import jax
import jax.numpy as jnp
from jax.experimental import pallas as pl
from jax.experimental.pallas import tpu as pltpu


# ---------------------------------------------------------------------------
# Kernels
# ---------------------------------------------------------------------------
def _pos_enc_row_kernel(x_ref, pe_ref, o_ref):
    # Batch dim is squeezed away by the BlockSpec: all refs are (TR, C).
    o_ref[...] = x_ref[...] + pe_ref[...]


def _pos_enc_batch_kernel(x_ref, pe_ref, o_ref):
    # x_ref / o_ref: (TB, R, C); pe_ref: (R, C) broadcast over the batch tile.
    o_ref[...] = x_ref[...] + pe_ref[...][None]


# ---------------------------------------------------------------------------
# Sinusoidal table (mirrors the PyTorch __init__, including odd-d_model branch)
# ---------------------------------------------------------------------------
def make_pe_table(d_model: int, max_len: int = 1000, dtype=jnp.float32) -> jnp.ndarray:
    position = jnp.arange(0, max_len, dtype=jnp.float32)[:, None]          # (max_len, 1)
    div_term = jnp.exp(
        jnp.arange(0, d_model, 2, dtype=jnp.float32) * (-math.log(10000.0) / d_model)
    )
    pe = jnp.zeros((max_len, d_model), dtype=jnp.float32)
    pe = pe.at[:, 0::2].set(jnp.sin(position * div_term))
    if d_model % 2 == 1:
        pe = pe.at[:, 1::2].set(jnp.cos(position * div_term[:-1]))
    else:
        pe = pe.at[:, 1::2].set(jnp.cos(position * div_term))
    # Build in the model dtype so the hot path never re-casts the table.
    return pe.astype(dtype)


# ---------------------------------------------------------------------------
# Hardware-aware sizing helpers
# ---------------------------------------------------------------------------
def _vmem_capacity_bytes() -> int:
    try:
        info = pltpu.get_tpu_info()
        cap = getattr(info, "vmem_capacity_bytes", None)
        if cap:
            return int(cap)
    except Exception:
        pass
    return 64 * 1024 * 1024  # conservative (v7x-sized) fallback


# ---------------------------------------------------------------------------
# Forward
# ---------------------------------------------------------------------------
def positional_encoding_forward(x: jnp.ndarray, pe: jnp.ndarray,
                                donate_x: bool = False) -> jnp.ndarray:
    """x: (B, S, D). pe: (max_len, D). Returns x + pe[:S] (broadcast over batch)."""
    B, S, D = x.shape
    pe_slice = pe[:S, :]
    if pe_slice.dtype != x.dtype:
        # Ideally callers build the table in x.dtype (make_pe_table(dtype=...)).
        pe_slice = pe_slice.astype(x.dtype)

    # --- fold (S, D) -> (R, C) with C lane-dense (multiple of 128) if possible ---
    if D % 128 == 0:
        R, C = S, D
    elif (S * D) % 128 == 0:
        R, C = (S * D) // 128, 128
    else:
        # Lane-sparse output would force masked vst.msk stores; a fused XLA add
        # is at least as fast for these tiny/odd shapes.
        return x + pe_slice[None, :, :]

    x_f = x.reshape(B, R, C)
    pe_f = pe_slice.reshape(R, C)

    itemsize = jnp.dtype(x.dtype).itemsize
    sublane = max(1, 32 // itemsize)                # 8 (f32) / 16 (bf16) / 32 (i8)
    row_bytes = C * itemsize
    slab_bytes = R * C * itemsize                   # one batch element, folded

    vmem_cap = _vmem_capacity_bytes()
    usable_vmem = int(0.8 * vmem_cap)
    # Generation-aware block budget: bigger blocks on v7x (3.2 TB/s HBM, so the
    # ~0.35 us per-step overhead dominates small tiles), ~4 MiB elsewhere.
    budget = 6 * 1024 * 1024 if vmem_cap <= 64 * 1024 * 1024 else 4 * 1024 * 1024

    io_aliases = {0: 0} if donate_x else {}

    use_batch_block = (B > 1) and (2 * slab_bytes <= budget)

    if use_batch_block:
        # ---- batch-block mode: small per-batch slab, block over batch ----
        TB = max(1, min(B, budget // slab_bytes))
        grid_b = pl.cdiv(B, TB)
        # v7x megacore: keep at least 2 grid steps so both TensorCores get work.
        if grid_b == 1 and B >= 2:
            TB = pl.cdiv(B, 2)
            grid_b = pl.cdiv(B, TB)
        # VMEM: x/out double-buffered (TB, R, C) + pe double-buffered (R, C).
        vmem_need = (4 * TB + 2) * slab_bytes
        if vmem_need > usable_vmem:
            TB = max(1, (usable_vmem - 2 * slab_bytes) // (4 * slab_bytes))
            grid_b = pl.cdiv(B, TB)
            vmem_need = (4 * TB + 2) * slab_bytes
        vmem_limit = min(usable_vmem, max(32 * 1024 * 1024, vmem_need + (4 << 20)))

        out = pl.pallas_call(
            _pos_enc_batch_kernel,
            out_shape=jax.ShapeDtypeStruct((B, R, C), x.dtype),
            grid_spec=pltpu.PrefetchScalarGridSpec(
                num_scalar_prefetch=0,
                grid=(grid_b,),
                in_specs=[
                    pl.BlockSpec((TB, R, C), lambda b: (b, 0, 0)),
                    pl.BlockSpec((R, C), lambda b: (0, 0)),
                ],
                out_specs=pl.BlockSpec((TB, R, C), lambda b: (b, 0, 0)),
            ),
            compiler_params=pltpu.CompilerParams(
                dimension_semantics=("parallel",),
                vmem_limit_bytes=int(vmem_limit),
            ),
            input_output_aliases=io_aliases,
        )(x_f, pe_f)
        return out.reshape(B, S, D)

    # ---- row-tile mode: ~budget-sized, sublane-aligned row tiles ----
    tr = max(sublane, (budget // row_bytes) // sublane * sublane)
    if tr >= R:
        tr = R
    # v7x megacore: if this is the only axis that can provide >1 step (B == 1),
    # split it in two so the second TensorCore isn't idle.
    if B == 1 and tr >= R and R > sublane:
        tr = pl.cdiv(pl.cdiv(R, 2), sublane) * sublane
    # Robustness: never let (x, pe, out) x double-buffer exceed usable VMEM.
    max_tr = (usable_vmem // (6 * row_bytes)) // sublane * sublane
    if max_tr < sublane:
        # Pathologically wide rows: a single sublane-group doesn't fit VMEM.
        return x + pe_slice[None, :, :]
    tr = min(tr, max_tr)
    grid_r = pl.cdiv(R, tr)

    block_bytes = tr * C * itemsize
    vmem_need = 6 * block_bytes                      # x, pe, out x double-buffer
    vmem_limit = min(usable_vmem, max(32 * 1024 * 1024, vmem_need + (4 << 20)))

    # Row-tile axis OUTER, batch axis INNER: pe's block index only changes when
    # the row tile changes, so it stays resident across the batch loop.
    out = pl.pallas_call(
        _pos_enc_row_kernel,
        out_shape=jax.ShapeDtypeStruct((B, R, C), x.dtype),
        grid_spec=pltpu.PrefetchScalarGridSpec(
            num_scalar_prefetch=0,
            grid=(grid_r, B),
            in_specs=[
                pl.BlockSpec((pl.Squeezed(), tr, C), lambda r, b: (b, r, 0)),
                pl.BlockSpec((tr, C), lambda r, b: (r, 0)),
            ],
            out_specs=pl.BlockSpec((pl.Squeezed(), tr, C), lambda r, b: (b, r, 0)),
        ),
        compiler_params=pltpu.CompilerParams(
            dimension_semantics=("parallel", "parallel"),
            vmem_limit_bytes=int(vmem_limit),
        ),
        input_output_aliases=io_aliases,
    )(x_f, pe_f)
    return out.reshape(B, S, D)


if __name__ == "__main__":
    B, S, D = 2, 8, 32
    MAX_LEN = 64  # small max_len for the synthetic test (module default is 1000)

    key = jax.random.PRNGKey(0)
    x = jax.random.normal(key, (B, S, D), dtype=jnp.float32)

    pe = make_pe_table(D, MAX_LEN, dtype=x.dtype)

    # reference (plain JAX, mirrors PyTorch forward)
    ref = x + pe[:S, :][None, :, :]

    out = positional_encoding_forward(x, pe)
    out = jax.block_until_ready(out)

    assert out.shape == (B, S, D)
    assert jnp.allclose(out, ref, atol=1e-6, rtol=1e-6)

    print("KERNEL_OK")
</pallas_src>

<mosaic_0001>
module attributes {stable_mosaic.version = 11 : i64} {
  func.func @_pos_enc_batch_kernel(%arg0: i32, %arg1: memref<1x2x128xf32, #tpu.memory_space<vmem>>, %arg2: memref<2x128xf32, #tpu.memory_space<vmem>>, %arg3: memref<1x2x128xf32, #tpu.memory_space<vmem>>) attributes {dimension_semantics = [#tpu.dimension_semantics<parallel>], iteration_bounds = array<i64: 2>, scalar_prefetch = 0 : i64, scratch_operands = 0 : i64, tpu.core_type = #tpu.core_type<tc>, window_params = [{transform_indices = @transform_0, window_bounds = array<i64: 1, 2, 128>}, {pipeline_mode = #tpu.pipeline_mode<synchronous>, transform_indices = @transform_1, window_bounds = array<i64: 2, 128>}, {transform_indices = @transform_2, window_bounds = array<i64: 1, 2, 128>}]} {
    %c0 = arith.constant 0 : index
    %c0_0 = arith.constant 0 : index
    %c0_1 = arith.constant 0 : index
    %0 = vector.load %arg1[%c0, %c0_0, %c0_1] : memref<1x2x128xf32, #tpu.memory_space<vmem>>, vector<1x2x128xf32>
    %c0_2 = arith.constant 0 : index
    %c0_3 = arith.constant 0 : index
    %1 = vector.load %arg2[%c0_2, %c0_3] : memref<2x128xf32, #tpu.memory_space<vmem>>, vector<2x128xf32>
    %2 = vector.shape_cast %1 : vector<2x128xf32> to vector<1x2x128xf32>
    %3 = arith.addf %0, %2 : vector<1x2x128xf32>
    %c0_4 = arith.constant 0 : index
    %c0_5 = arith.constant 0 : index
    %c0_6 = arith.constant 0 : index
    %4 = vector.load %arg3[%c0_4, %c0_5, %c0_6] : memref<1x2x128xf32, #tpu.memory_space<vmem>>, vector<1x2x128xf32>
    tpu.vector_store %arg3[%c0_4, %c0_5, %c0_6], %3 {strides = array<i32>} : memref<1x2x128xf32, #tpu.memory_space<vmem>>, vector<1x2x128xf32>,
    return
  }
  func.func @transform_0(%arg0: i32) -> (i32, i32, i32) {
    %c0_i32 = arith.constant 0 : i32
    %c0_i32_0 = arith.constant 0 : i32
    %c0_i32_1 = arith.constant 0 : i32
    return %arg0, %c0_i32, %c0_i32_0 : i32, i32, i32
  }
  func.func @transform_1(%arg0: i32) -> (i32, i32) {
    %c0_i32 = arith.constant 0 : i32
    %c0_i32_0 = arith.constant 0 : i32
    %c0_i32_1 = arith.constant 0 : i32
    return %c0_i32, %c0_i32_0 : i32, i32
  }
  func.func @transform_2(%arg0: i32) -> (i32, i32, i32) {
    %c0_i32 = arith.constant 0 : i32
    %c0_i32_0 = arith.constant 0 : i32
    %c0_i32_1 = arith.constant 0 : i32
    return %arg0, %c0_i32, %c0_i32_0 : i32, i32, i32
  }
}

</mosaic_0001>

<bundles_post_ra>
// kernel: tpu_custom_call.1
= control target key start
LH: loop header
LB: loop body
LE: loop exit
PB: predicated region body
PF: predicated region fallthrough
CT: control target
= control target key end

     0   :  { %7 = vsyncpa [#allocation3], 0  ;;  %s584_s0 = inlined_call_operand.hbm [shape: f32[2,2,128], index: 0, kind: input, shape index: {}]   ;;  %s585_s1 = inlined_call_operand.vmem [shape: f32[2,128], index: 1, kind: input, shape index: {}]   ;;  %s586_s2 = inlined_call_operand.hbm [shape: f32[2,2,128], index: 2, kind: output, shape index: {}]  }
   0x1   :  { %9 = vsyncpa [#allocation3 + $0x1], 0 }
   0x2   :  { %10 = vsyncpa [#allocation4], 0 }
   0x3   :  { %12 = vsyncpa [#allocation4 + $0x1], 0  ;;  %s420_s9 = smov 0   ;;  %s422_s10 = smov 0  }
   0x4   :  { %s424_s11 = smov 0   ;;  %s426_s12 = smov 0  }
   0x5 LB: > { %s441_s13 = sadd.s32 4294967295, %s401_s12   ;;  %s247_s14 = sadd.s32 4294967294, %s401_s12   ;;  %s401_s12 = sphi %s426_s12, %s601_s12   ;;  %s397_s11 = sphi %s424_s11, %s600_s11   ;;  %s393_s10 = sphi %s422_s10, %s599_s10   ;;  %s389_s9 = sphi %s420_s9, %s598_s9  }
   0x6   : > { %s445_s15 = sadd.s32 1, %s401_s12   ;;  %s25_s16 = sadd.s32 1, %s397_s11 }
   0x7   : > { %s22_s17 = ssub.s32 %s401_s12, %s445_s15  ;;  %p32_p0 = scmp.ne.s32.totalorder %s397_s11, %s393_s10 }
   0x8   : > { %p23_p1 = scmp.eq.s32.totalorder %s22_s17, 0  ;;  %p33_p2 = scmp.eq.s32.totalorder %s401_s12, 0 }
   0x9   : > { %p38_p3 = scmp.ne.s32.totalorder %s393_s10, %s389_s9  ;;  %p39_p4 = scmp.eq.s32.totalorder %s441_s13, 0 }
   0xa   : > { %s457_s18 = scalar_select %p23_p1, %s397_s11, %s25_s16  }
   0xb   : > { %p459_p5 = por %p33_p2, %p32_p0  ;;  %p463_p6 = por %p39_p4, %p38_p3 }
   0xc   : > { %p83_p7 = scmp.eq.s32.totalorder %s441_s13, 1  ;;  %p89_p8 = scmp.eq.s32.totalorder %s247_s14, 1 }
   0xd   : > { %p271_p10 = scmp.lt.s32.totalorder %s401_s12, 2  ;;  %s112_s23 = sand.u32 1, %s397_s11  }
   0xe   : > { %p470_p11 = por %p83_p7, %p32_p0  ;;  %p474_p12 = por %p89_p8, %p38_p3 }
   0xf   : > { %s251_s24 = sshll.u32 %s401_s12, 5  ;;  %s250_s25 = sshll.u32 %s112_s23, 1 }
  0x10   : > { %s590_s21 = scalar_select %p470_p11, 1, 0 }
  0x11   : > { %s591_s22 = scalar_select %p474_p12, 1, 0 }
  0x12   : > { %s483_s28 = scalar_lea.hbm %s584_s0, %s251_s24  ;;  %s116_s29 = scalar_lea.vmem [#allocation2], %s250_s25 }
  0x13   : > { %s123_s30 = sshll.u32 %s116_s29, 4  ;;  %p487_p13 = pnand %p271_p10, %p459_p5  ;;  %s491_s30 = int_to_ptr.vmem [resolvable:$true] %s123_s30 }
  0x14   : > { %s113_s4 = scalar_lea.sflag [#allocation3], %s112_s23  ;;  %s305_s5 = scalar_lea.hbm %s483_s28, 32 }
  0x15   : > { %p306_p2 = scmp.ne.s32.totalorder %s483_s28, %s305_s5  ;;  %p307_p3 = pneg %p487_p13 }
  0x16   : > { %s310_s8 = scalar_lea.hbm %s584_s0, 64  ;;  %p311_p5 = scmp.lt.u32.totalorder %s483_s28, %s584_s0 }
  0x17   : > { %p308_p4 = pnand %p307_p3, %p306_p2  ;;  %p312_p8 = scmp.lt.u32.totalorder %s310_s8, %s305_s5 }
  0x18   : > { %p314_p9 = scmp.lt.u32.totalorder %s305_s5, %s483_s28 }
  0x19   : > { %p309_p7 = pneg %p308_p4  ;;  %p313_p10 = por %p312_p8, %p311_p5 }
  0x1b   : > { %p315_p0 = por %p314_p9, %p313_p10 }
  0x1d   : > { %p316_p1 = pnand %p315_p0, %p309_p7 }
  0x1f   : > { %319 = shalt.err (!%p316_p1)
}
  0x20   : > { %s320_s17 = scalar_lea.vmem %s491_s30, 32  ;;  %s403_s19 = smov [#allocation2]  }
  0x21   : > { %p321_p2 = scmp.ne.s32.totalorder %s491_s30, %s320_s17  ;;  %s325_s23 = sshll.u32 %s403_s19, 4  ;;  %s326_s23 = int_to_ptr.vmem [resolvable:$false] %s325_s23 }
  0x22   : > { %s327_s24 = scalar_lea.vmem %s326_s23, 64  ;;  %p328_p11 = scmp.lt.s32.totalorder %s491_s30, %s326_s23 }
  0x23   : > { %p323_p4 = pnand %p321_p2, %p307_p3  ;;  %p329_p5 = scmp.lt.s32.totalorder %s327_s24, %s320_s17 }
  0x25   : > { %p324_p12 = pneg %p323_p4  ;;  %p330_p8 = por %p329_p5, %p328_p11 }
  0x27   : > { %p331_p9 = pnand %p330_p8, %p324_p12 }
  0x29   : > { %334 = shalt.err (!%p331_p9)
}
  0x2a   : > { %266 = dma.hbm_to_vmem [thread:$0]  (!%p487_p13), %s483_s28, 32, %s491_s30, %s113_s4  }
  0x2b   : > { %p593_p0 = scmp.lt.s32.totalorder %s401_s12, 3  ;;  %p594_p1 = scmp.ge.s32.totalorder %s401_s12, 1 }
  0x2d   : > { %p129_p3 = pnand %p594_p1, %p593_p0 }
  0x2e   : > { %s525_s25 = sand.u32 (!%p129_p3), 1, %s393_s10  }
  0x2f   : > { %132 = sbr.rel (%p129_p3) target bundleno = 81 (0x51), region = 28  ;;  %s253_s26 = sshll.u32 (!%p129_p3), %s525_s25, 1 }
  0x30   : > { %s135_s27 = scalar_lea.sflag (!%p129_p3), [#allocation3], %s525_s25  ;;  %s138_s29 = scalar_lea.vmem (!%p129_p3), [#allocation2], %s253_s26 }
  0x36   : > { %380 = dma.done.wait (%p463_p6), %s135_s27, 32  }
  0x37   : > { %382 = vsyncadd (%p463_p6), %s135_s27, 4294967264  ;;  %s158_s28 = scalar_lea.vmem [#allocation5], %s253_s26  ;;  %s256_s3 = sshll.u32 %s441_s13, 5  ;;  %v159_v0 = vld [vmem:[%s138_s29] sm:$0x3] }
  0x38   : > { %s177_s30 = sshll.u32 %s158_s28, 4  ;;  %v160_v1 = vld [vmem:[%s585_s1] sm:$0x3]  ;;  %s542_s20 = scalar_lea.hbm %s586_s2, %s256_s3  ;;  %s537_s30 = int_to_ptr.vmem [resolvable:$true] %s177_s30 }
  0x39   : > { %v161_v2 = vadd.f32 %v160_v1, %v159_v0  ;;  %s164_s8 = scalar_lea.sflag [#allocation4], %s525_s25  ;;  %s335_s14 = scalar_lea.vmem %s537_s30, 32 }
  0x3a   : > { %p336_p6 = scmp.ne.s32.totalorder %s537_s30, %s335_s14  ;;  %p595_p11 = scmp.ne.s32.totalorder %s590_s21, 0 }
  0x3b   : > { %162 = vst [vmem:[%s158_s28] sm:$0x3] %v161_v2  ;;  %s404_s13 = smov [#allocation5]  }
  0x3c   : > { %p337_p12 = pnand %p336_p6, %p595_p11  ;;  %s339_s16 = sshll.u32 %s404_s13, 4  ;;  %s340_s16 = int_to_ptr.vmem [resolvable:$false] %s339_s16 }
  0x3d   : > { %s341_s17 = scalar_lea.vmem %s340_s16, 64  ;;  %p342_p7 = scmp.lt.s32.totalorder %s537_s30, %s340_s16 }
  0x3e   : > { %p338_p13 = pneg %p337_p12  ;;  %p343_p10 = scmp.lt.s32.totalorder %s341_s17, %s335_s14 }
  0x40   : > { %p344_p2 = por %p343_p10, %p342_p7 }
  0x42   : > { %p345_p4 = pnand %p344_p2, %p338_p13 }
  0x44   : > { %348 = shalt.err (!%p345_p4)
}
  0x45   : > { %s349_s19 = scalar_lea.hbm %s542_s20, 32  ;;  %s353_s25 = scalar_lea.hbm %s586_s2, 64 }
  0x46   : > { %p350_p5 = scmp.ne.s32.totalorder %s542_s20, %s349_s19  ;;  %p354_p0 = scmp.lt.u32.totalorder %s542_s20, %s586_s2 }
  0x47   : > { %p355_p1 = scmp.lt.u32.totalorder %s353_s25, %s349_s19  ;;  %p357_p6 = scmp.lt.u32.totalorder %s349_s19, %s542_s20 }
  0x48   : > { %p351_p8 = pnand %p350_p5, %p595_p11 }
  0x49   : > { %p356_p3 = por %p355_p1, %p354_p0 }
  0x4a   : > { %p352_p9 = pneg %p351_p8 }
  0x4b   : > { %p358_p12 = por %p357_p6, %p356_p3 }
  0x4d   : > { %p359_p13 = pnand %p358_p12, %p352_p9 }
  0x4f   : > { %362 = shalt.err (!%p359_p13)
}
  0x50   : > { %261 = dma.vmem_to_hbm [thread:$0]  (%p595_p11), %s537_s30, 32, %s542_s20, %s164_s8  }
  0x51 PF: > { %s189_s29 = sand.u32 1, %s389_s9   ;;  %p596_p7 = scmp.ne.s32.totalorder %s591_s22, 0 }
  0x52   : > { %p597_p10 = scmp.ge.s32.totalorder %s401_s12, 2  ;;  %s190_s28 = scalar_lea.sflag [#allocation4], %s189_s29 }
  0x54   : > { %p268_p2 = pnand %p597_p10, %p596_p7 }
  0x56   : > { %384 = dma.done.wait (!%p268_p2), %s190_s28, 32  }
  0x57   : > { %386 = vsyncadd (!%p268_p2), %s190_s28, 4294967264  ;;  %p15_p4 = scmp.ge.s32.totalorder %s445_s15, 4   ;;  %s598_s9 = smov %s393_s10 }
  0x58   : > { %s599_s10 = smov %s397_s11  ;;  %s600_s11 = smov %s457_s18 }
  0x59   : > { %s601_s12 = smov %s445_s15  ;;  %17 = sbr.rel (!%p15_p4) target bundleno = 5 (0x5), region = 73 }
  0x60   :  { %195 = vsyncpa [#allocation3], 1 }
  0x61   :  { %197 = vsyncpa [#allocation3 + $0x1], 1 }
  0x62   :  { %198 = vsyncpa [#allocation4], 1 }
  0x63   :  { %200 = vsyncpa [#allocation4 + $0x1], 1 }

</bundles_post_ra>
